<compile_context>
chip_gen: v5e
topology: v5e:2x2
jax: 0.10.0
libtpu: 0.0.40
codegen_flags: <defaults>
</compile_context>

<pallas_src>
import jax
import jax.numpy as jnp
from jax.experimental import pallas as pl
from jax.experimental.pallas import tpu as pltpu


def _round_up(x, m):
    return (x + m - 1) // m * m


def _mlp_kernel(x_ref, w1_ref, b1_ref, w2_ref, b2_ref, o_ref):
    # x_ref: [TB, D_in_p] (bf16), w1_ref: [D_in_p, H_p] (bf16),
    # b1_ref: [1, H_p] (f32), w2_ref: [H_p, D_out_p] (bf16),
    # b2_ref: [1, D_out_p] (f32), o_ref: [TB, D_out_p]
    x = x_ref[...]
    # linear1 on the MXU (bf16 inputs, f32 accumulate)
    z1 = jnp.dot(x, w1_ref[...], preferred_element_type=jnp.float32)
    z1 = z1 + b1_ref[...]                       # f32 bias broadcast over batch
    # sigmoid in f32: exp/recip on the EUP slot, cheap VPU add
    h = jax.nn.sigmoid(z1)                      # [TB, H_p], f32
    # linear2 on the MXU (cast activations back to bf16 to feed the fast path)
    z2 = jnp.dot(h.astype(w2_ref.dtype), w2_ref[...],
                 preferred_element_type=jnp.float32)
    o_ref[...] = (z2 + b2_ref[...]).astype(o_ref.dtype)


def net_forward(x, w1, b1, w2, b2, *, tb=512, compute_dtype=jnp.bfloat16):
    """Fused MLP forward.

    x: [B, D_in]; w1: [D_in, H]; b1: [H]; w2: [H, D_out]; b2: [D_out].
    Weights are stored transposed vs. torch.nn.Linear so the kernel does
    plain row-major matmuls.
    """
    B, D_in = x.shape
    H = w1.shape[1]
    D_out = w2.shape[1]

    # Lane-dense (multiple-of-128) feature dims; batch tile TB (sublane-aligned).
    d_in_p = _round_up(D_in, 128)
    h_p = _round_up(H, 128)
    d_out_p = _round_up(D_out, 128)
    TB = min(tb, _round_up(B, 8))
    b_p = _round_up(B, TB)

    f32 = jnp.float32
    x_p = jnp.zeros((b_p, d_in_p), compute_dtype).at[:B, :D_in].set(
        x.astype(compute_dtype))
    w1_p = jnp.zeros((d_in_p, h_p), compute_dtype).at[:D_in, :H].set(
        w1.astype(compute_dtype))
    w2_p = jnp.zeros((h_p, d_out_p), compute_dtype).at[:H, :D_out].set(
        w2.astype(compute_dtype))
    b1_p = jnp.zeros((1, h_p), f32).at[0, :H].set(b1.astype(f32))
    b2_p = jnp.zeros((1, d_out_p), f32).at[0, :D_out].set(b2.astype(f32))

    out_p = pl.pallas_call(
        _mlp_kernel,
        out_shape=jax.ShapeDtypeStruct((b_p, d_out_p), x.dtype),
        grid_spec=pl.GridSpec(
            grid=(b_p // TB,),
            in_specs=[
                # activations: walk the batch
                pl.BlockSpec((TB, d_in_p), lambda i: (i, 0)),
                # weights / biases: constant index -> VMEM-resident across steps
                pl.BlockSpec((d_in_p, h_p), lambda i: (0, 0)),
                pl.BlockSpec((1, h_p), lambda i: (0, 0)),
                pl.BlockSpec((h_p, d_out_p), lambda i: (0, 0)),
                pl.BlockSpec((1, d_out_p), lambda i: (0, 0)),
            ],
            out_specs=pl.BlockSpec((TB, d_out_p), lambda i: (i, 0)),
        ),
        compiler_params=pltpu.CompilerParams(
            dimension_semantics=("parallel",)),
    )(x_p, w1_p, b1_p, w2_p, b2_p)

    # Strip padding.
    return out_p[:B, :D_out]


def _init_linear(key, fan_in, fan_out, dtype=jnp.float32):
    # Deterministic, PyTorch-like uniform(-1/sqrt(fan_in), 1/sqrt(fan_in)) init.
    kw, kb = jax.random.split(key)
    bound = 1.0 / jnp.sqrt(jnp.asarray(fan_in, dtype))
    w = jax.random.uniform(kw, (fan_in, fan_out), dtype, -bound, bound)
    b = jax.random.uniform(kb, (fan_out,), dtype, -bound, bound)
    return w, b


if __name__ == "__main__":
    # Shapes implied by Net(D_in, H, D_out); small demo shapes.
    B, D_in, H, D_out = 8, 32, 64, 16

    key = jax.random.PRNGKey(0)
    kx, k1, k2 = jax.random.split(key, 3)

    x = jax.random.normal(kx, (B, D_in), jnp.float32)
    w1, b1 = _init_linear(k1, D_in, H)
    w2, b2 = _init_linear(k2, H, D_out)

    out = net_forward(x, w1, b1, w2, b2)
    jax.block_until_ready(out)

    # Reference check in plain f32 JAX (same math as the PyTorch forward).
    ref = jax.nn.sigmoid(x @ w1 + b1) @ w2 + b2
    assert out.shape == (B, D_out)
    # bf16 MXU inputs with f32 accumulation -> loose-ish tolerance vs f32 ref.
    assert jnp.allclose(out, ref, atol=2e-2, rtol=2e-2), float(
        jnp.max(jnp.abs(out - ref)))

    print("KERNEL_OK")
</pallas_src>

<mosaic_0001>
module attributes {stable_mosaic.version = 11 : i64} {
  func.func @_mlp_kernel(%arg0: i32, %arg1: memref<8x128xbf16, #tpu.memory_space<vmem>>, %arg2: memref<128x128xbf16, #tpu.memory_space<vmem>>, %arg3: memref<1x128xf32, #tpu.memory_space<vmem>>, %arg4: memref<128x128xbf16, #tpu.memory_space<vmem>>, %arg5: memref<1x128xf32, #tpu.memory_space<vmem>>, %arg6: memref<8x128xf32, #tpu.memory_space<vmem>>) attributes {dimension_semantics = [#tpu.dimension_semantics<parallel>], iteration_bounds = array<i64: 1>, scalar_prefetch = 0 : i64, scratch_operands = 0 : i64, tpu.core_type = #tpu.core_type<tc>, window_params = [{transform_indices = @transform_0, window_bounds = array<i64: 8, 128>}, {pipeline_mode = #tpu.pipeline_mode<synchronous>, transform_indices = @transform_1, window_bounds = array<i64: 128, 128>}, {pipeline_mode = #tpu.pipeline_mode<synchronous>, transform_indices = @transform_2, window_bounds = array<i64: 1, 128>}, {pipeline_mode = #tpu.pipeline_mode<synchronous>, transform_indices = @transform_3, window_bounds = array<i64: 128, 128>}, {pipeline_mode = #tpu.pipeline_mode<synchronous>, transform_indices = @transform_4, window_bounds = array<i64: 1, 128>}, {transform_indices = @transform_5, window_bounds = array<i64: 8, 128>}]} {
    %c0 = arith.constant 0 : index
    %c0_0 = arith.constant 0 : index
    %0 = vector.load %arg1[%c0, %c0_0] : memref<8x128xbf16, #tpu.memory_space<vmem>>, vector<8x128xbf16>
    %c0_1 = arith.constant 0 : index
    %c0_2 = arith.constant 0 : index
    %1 = vector.load %arg2[%c0_1, %c0_2] : memref<128x128xbf16, #tpu.memory_space<vmem>>, vector<128x128xbf16>
    %cst = arith.constant dense<0.000000e+00> : vector<8x128xf32>
    %2 = tpu.matmul %0, %1, %cst {dimension_numbers = #tpu.dot_dimension_numbers<[1], [0], [0], [1], [0, 0, 1, 1], [], []>} : vector<8x128xbf16>, vector<128x128xbf16>, vector<8x128xf32> -> vector<8x128xf32>
    %c0_3 = arith.constant 0 : index
    %c0_4 = arith.constant 0 : index
    %3 = vector.load %arg3[%c0_3, %c0_4] : memref<1x128xf32, #tpu.memory_space<vmem>>, vector<1x128xf32>
    %4 = vector.broadcast %3 : vector<1x128xf32> to vector<8x128xf32>
    %5 = arith.addf %2, %4 : vector<8x128xf32>
    %6 = arith.negf %5 : vector<8x128xf32>
    %7 = math.exp %6 : vector<8x128xf32>
    %cst_5 = arith.constant 1.000000e+00 : f32
    %8 = vector.broadcast %cst_5 : f32 to vector<8x128xf32>
    %9 = arith.addf %8, %7 : vector<8x128xf32>
    %10 = arith.divf %8, %9 : vector<8x128xf32>
    %11 = arith.truncf %10 : vector<8x128xf32> to vector<8x128xbf16>
    %c0_6 = arith.constant 0 : index
    %c0_7 = arith.constant 0 : index
    %12 = vector.load %arg4[%c0_6, %c0_7] : memref<128x128xbf16, #tpu.memory_space<vmem>>, vector<128x128xbf16>
    %cst_8 = arith.constant dense<0.000000e+00> : vector<8x128xf32>
    %13 = tpu.matmul %11, %12, %cst_8 {dimension_numbers = #tpu.dot_dimension_numbers<[1], [0], [0], [1], [0, 0, 1, 1], [], []>} : vector<8x128xbf16>, vector<128x128xbf16>, vector<8x128xf32> -> vector<8x128xf32>
    %c0_9 = arith.constant 0 : index
    %c0_10 = arith.constant 0 : index
    %14 = vector.load %arg5[%c0_9, %c0_10] : memref<1x128xf32, #tpu.memory_space<vmem>>, vector<1x128xf32>
    %15 = vector.broadcast %14 : vector<1x128xf32> to vector<8x128xf32>
    %16 = arith.addf %13, %15 : vector<8x128xf32>
    %c0_11 = arith.constant 0 : index
    %c0_12 = arith.constant 0 : index
    %17 = vector.load %arg6[%c0_11, %c0_12] : memref<8x128xf32, #tpu.memory_space<vmem>>, vector<8x128xf32>
    tpu.vector_store %arg6[%c0_11, %c0_12], %16 {strides = array<i32>} : memref<8x128xf32, #tpu.memory_space<vmem>>, vector<8x128xf32>,
    return
  }
  func.func @transform_0(%arg0: i32) -> (i32, i32) {
    %c0_i32 = arith.constant 0 : i32
    %c0_i32_0 = arith.constant 0 : i32
    return %arg0, %c0_i32 : i32, i32
  }
  func.func @transform_1(%arg0: i32) -> (i32, i32) {
    %c0_i32 = arith.constant 0 : i32
    %c0_i32_0 = arith.constant 0 : i32
    %c0_i32_1 = arith.constant 0 : i32
    return %c0_i32, %c0_i32_0 : i32, i32
  }
  func.func @transform_2(%arg0: i32) -> (i32, i32) {
    %c0_i32 = arith.constant 0 : i32
    %c0_i32_0 = arith.constant 0 : i32
    %c0_i32_1 = arith.constant 0 : i32
    return %c0_i32, %c0_i32_0 : i32, i32
  }
  func.func @transform_3(%arg0: i32) -> (i32, i32) {
    %c0_i32 = arith.constant 0 : i32
    %c0_i32_0 = arith.constant 0 : i32
    %c0_i32_1 = arith.constant 0 : i32
    return %c0_i32, %c0_i32_0 : i32, i32
  }
  func.func @transform_4(%arg0: i32) -> (i32, i32) {
    %c0_i32 = arith.constant 0 : i32
    %c0_i32_0 = arith.constant 0 : i32
    %c0_i32_1 = arith.constant 0 : i32
    return %c0_i32, %c0_i32_0 : i32, i32
  }
  func.func @transform_5(%arg0: i32) -> (i32, i32) {
    %c0_i32 = arith.constant 0 : i32
    %c0_i32_0 = arith.constant 0 : i32
    return %arg0, %c0_i32 : i32, i32
  }
}

</mosaic_0001>

<bundles_post_ra>
// kernel: tpu_custom_call.1
= control target key start
LH: loop header
LB: loop body
LE: loop exit
PB: predicated region body
PF: predicated region fallthrough
CT: control target
= control target key end

     0   :  { %10 = vsyncpa [#allocation3], 0  ;;  %s517_s0 = inlined_call_operand.hbm [shape: bf16[8,128], index: 0, kind: input, shape index: {}]   ;;  %s518_s1 = inlined_call_operand.hbm [shape: bf16[128,128], index: 1, kind: input, shape index: {}]   ;;  %s519_s2 = inlined_call_operand.vmem [shape: f32[1,128], index: 2, kind: input, shape index: {}]   ;;  %s520_s3 = inlined_call_operand.hbm [shape: bf16[128,128], index: 3, kind: input, shape index: {}]   ;;  %s521_s4 = inlined_call_operand.vmem [shape: f32[1,128], index: 4, kind: input, shape index: {}]   ;;  %s522_s5 = inlined_call_operand.hbm [shape: f32[8,128], index: 5, kind: output, shape index: {}]  }
   0x1   :  { %11 = vsyncpa [#allocation6], 0  ;;  %s28_s20 = sshll.u32 %s518_s1, 4  ;;  %s29_s20 = int_to_ptr.hbm [resolvable:$true] %s28_s20 }
   0x2   :  { %12 = vsyncpa [#allocation4], 0  ;;  %s463_s21 = smov [#allocation5]   ;;  %s18_s25 = sshll.u32 %s517_s0, 4  ;;  %s19_s25 = int_to_ptr.hbm [resolvable:$true] %s18_s25 }
   0x3   :  { %s30_s22 = sshll.u32 %s463_s21, 4  ;;  %s464_s26 = smov 64   ;;  %s31_s22 = int_to_ptr.vmem [resolvable:$true] %s30_s22 }
   0x4   :  { %s465_s27 = smov 4   ;;  %s466_s28 = smov [#allocation2]  }
   0x5   :  { %36 = dma.hbm_to_vmem [thread:$0]  %s29_s20, 1024, %s31_s22, [#allocation6], %s464_s26, %s464_s26, %s465_s27  }
   0x6   :  { %s20_s29 = sshll.u32 %s466_s28, 4  ;;  %s43_s7 = sshll.u32 %s520_s3, 4  ;;  %s21_s29 = int_to_ptr.vmem [resolvable:$true] %s20_s29  ;;  %s44_s7 = int_to_ptr.hbm [resolvable:$true] %s43_s7 }
   0x7   :  { %23 = dma.hbm_to_vmem [thread:$0]  %s19_s25, 64, %s21_s29, [#allocation3]  }
   0x8   :  { %s467_s1 = smov [#allocation7]  }
   0x9   :  { %s45_s8 = sshll.u32 %s467_s1, 4  ;;  %s46_s8 = int_to_ptr.vmem [resolvable:$true] %s45_s8 }
   0xa   :  { %51 = dma.hbm_to_vmem [thread:$0]  %s44_s7, 1024, %s46_s8, [#allocation6], %s464_s26, %s464_s26, %s465_s27  }
   0xb   :  { %457 = dma.done.wait [#allocation3], 64  }
   0xc   :  { %458 = vsyncadd [#allocation3], 4294967232 }
   0xd   :  { %459 = dma.done.wait [#allocation6], 2048  }
   0xe   :  { %460 = vsyncadd [#allocation6], 4294965248  ;;  %v340_v0 = vld [vmem:[#allocation5 + $0x38] sm:$0xff]  ;;  %v339_v1 = vld [vmem:[#allocation5 + $0x30] sm:$0xff]  ;;  %s468_s10 = smov [#allocation8]   ;;  %s257_s14 = sshll.u32 %s522_s5, 4  ;;  %s258_s14 = int_to_ptr.hbm [resolvable:$true] %s257_s14 }
   0xf   :  { %135 = vmatpush.bf16.msra.mxu0 %v340_v0  ;;  %v338_v2 = vld [vmem:[#allocation5 + $0x28] sm:$0xff]  ;;  %v337_v3 = vld [vmem:[#allocation5 + $0x20] sm:$0xff]  ;;  %v336_v4 = vld [vmem:[#allocation5 + $0x18] sm:$0xff]  ;;  %s255_s11 = sshll.u32 %s468_s10, 4  ;;  %s256_s11 = int_to_ptr.vmem [resolvable:$true] %s255_s11 }
  0x10   :  { %v335_v5 = vld [vmem:[#allocation5 + $0x10] sm:$0xff]  ;;  %v334_v6 = vld [vmem:[#allocation5 + $0x8] sm:$0xff]  ;;  %v333_v7 = vld [vmem:[#allocation5] sm:$0xff] }
  0x11   :  { %v66_v8 = vld [vmem:[#allocation2] sm:$0xf]  ;;  %v347_v10 = vld [vmem:[#allocation7 + $0x30] sm:$0xff]  ;;  %v346_v11 = vld [vmem:[#allocation7 + $0x28] sm:$0xff] }
  0x12   :  { %v348_v9 = vld [vmem:[#allocation7 + $0x38] sm:$0xff]  ;;  %v345_v12 = vld [vmem:[#allocation7 + $0x20] sm:$0xff]  ;;  %v343_v14 = vld [vmem:[#allocation7 + $0x10] sm:$0xff] }
  0x13   :  { %136 = vmatpush.bf16.msra.mxu0 %v339_v1  ;;  %236 = vmatpush.bf16.msra.mxu1 %v348_v9  ;;  %v344_v13 = vld [vmem:[#allocation7 + $0x18] sm:$0xff]  ;;  %v342_v15 = vld [vmem:[#allocation7 + $0x8] sm:$0xff]  ;;  %v341_v16 = vld [vmem:[#allocation7] sm:$0xff] }
  0x14   :  { %v355_v17 = vld [vmem:[%s519_s2] ss:$0 sm:$0xff] }
  0x15   :  { %v356_v35 = vld [vmem:[%s521_s4] ss:$0 sm:$0xff] }
  0x17   :  { %137 = vmatpush.bf16.msra.mxu0 %v338_v2  ;;  %237 = vmatpush.bf16.msra.mxu1 %v347_v10 }
  0x1b   :  { %138 = vmatpush.bf16.msra.mxu0 %v337_v3  ;;  %238 = vmatpush.bf16.msra.mxu1 %v346_v11 }
  0x1f   :  { %139 = vmatpush.bf16.msra.mxu0 %v336_v4  ;;  %239 = vmatpush.bf16.msra.mxu1 %v345_v12 }
  0x23   :  { %140 = vmatpush.bf16.msra.mxu0 %v335_v5  ;;  %240 = vmatpush.bf16.msra.mxu1 %v344_v13 }
  0x27   :  { %141 = vmatpush.bf16.msra.mxu0 %v334_v6  ;;  %241 = vmatpush.bf16.msra.mxu1 %v343_v14 }
  0x2b   :  { %142 = vmatpush.bf16.msra.mxu0 %v333_v7  ;;  %242 = vmatpush.bf16.msra.mxu1 %v342_v15 }
  0x2e   :  { %143 = vmatmul.bf16.vlgmr.msra.gmra.mxu0 %v66_v8 }
  0x2f   :  { %243 = vmatpush.bf16.msra.mxu1 %v341_v16 }
  0xab   :  { %v144_v18 = vpop.f32.mrf.mxu0 }
  0xac   :  { %v145_v19 = vadd.f32 %v355_v17, %v144_v18 }
  0xae   :  { %v300_v20 = vmul.f32 -1.442695, %v145_v19 }
  0xb0   :  { %357 = vpow2.f32 %v300_v20 }
  0xb3   :  { %v146_v21 = vpop.f32.mrf.mxu0 }
  0xb6   :  { %v358_v22 = vpop.eup %357 }
  0xb7   :  { %v151_v23 = vadd.f32 1.0, %v358_v22 }
  0xb9   :  { %359 = vrcp.f32 %v151_v23  ;;  %v163_v27 = vand.u32 2147483648, %v151_v23  ;;  %v161_v29 = vand.u32 2147483647, %v151_v23  ;;  %vm157_vm1 = vweird.f32 %v151_v23 }
  0xbb   :  { %v164_v31 = vor.u32 1.1754944e-38, %v163_v27  ;;  %vm162_vm3 = vcmp.eq.f32.partialorder %v161_v29, 8.507059e+37 }
  0xbf   :  { %v360_v24 = vpop.eup %359 }
  0xc0   :  { %v153_v25 = vmul.f32 %v360_v24, %v151_v23  ;;  %vm158_vm0 = vweird.f32 %v360_v24 }
  0xc1   :  { %vm159_vm2 = vmor %vm157_vm1, %vm158_vm0 }
  0xc2   :  { %v154_v26 = vsub.f32 1.0, %v153_v25 }
  0xc4   :  { %v155_v28 = vmul.f32 %v360_v24, %v154_v26 }
  0xc6   :  { %v156_v30 = vadd.f32 %v360_v24, %v155_v28 }
  0xc8   :  { %v160_v32 = vsel %vm159_vm2, %v360_v24, %v156_v30 }
  0xc9   :  { %v165_v33 = vsel %vm162_vm3, %v164_v31, %v160_v32 }
  0xca   :  { %v167_v34 = vpack.c.bf16 %v165_v33, %v165_v33 }
  0xcc   :  { %244 = vmatmul.bf16.vlgmr.msra.gmra.mxu1 %v167_v34 }
 0x149   :  { %v245_v36 = vpop.f32.mrf.mxu1 }
 0x14a   :  { %v246_v37 = vadd.f32 %v356_v35, %v245_v36 }
 0x14c   :  { %249 = vst [vmem:[#allocation8] sm:$0xff] %v246_v37 }
 0x14d   :  { %260 = dma.vmem_to_hbm [thread:$0]  %s256_s11, 128, %s258_s14, [#allocation4]  }
 0x151   :  { %v247_v38 = vpop.f32.mrf.mxu1 }
 0x152   :  { %461 = dma.done.wait [#allocation4], 128  }
 0x153   :  { %462 = vsyncadd [#allocation4], 4294967168 }
 0x154   :  { %265 = vsyncpa [#allocation3], 1 }
 0x155   :  { %266 = vsyncpa [#allocation6], 1 }
 0x156   :  { %267 = vsyncpa [#allocation4], 1 }

</bundles_post_ra>
